<compile_context>
chip_gen: v5e
topology: v5e:2x2
jax: 0.10.0
libtpu: 0.0.40
codegen_flags: <defaults>
</compile_context>

<pallas_src>
import math

import jax
import jax.numpy as jnp
from jax.experimental import pallas as pl
from jax.experimental.pallas import tpu as pltpu

_LANES = 128
_SUBLANES = 8  # f32 rows per sublane tile; sub-32-bit dtypes pack 2x / 4x rows


def make_positional_encoding_table(d_model: int, max_len: int = 5000) -> jnp.ndarray:
    """Deterministic sinusoidal PE table, identical to the PyTorch __init__ (fp32)."""
    assert d_model % 2 == 0, "PositionalEncoding requires an even d_model"
    position = jnp.arange(0, max_len, dtype=jnp.float32)[:, None]           # (max_len, 1)
    div_term = jnp.exp(
        jnp.arange(0, d_model, 2, dtype=jnp.float32) * (-math.log(10000.0) / d_model)
    )                                                                        # (d_model//2,)
    angles = position * div_term                                             # (max_len, d_model//2)
    pe = jnp.zeros((max_len, d_model), dtype=jnp.float32)
    pe = pe.at[:, 0::2].set(jnp.sin(angles))
    pe = pe.at[:, 1::2].set(jnp.cos(angles))
    return pe                                                                # (max_len, d_model)


def pack_positional_encoding_table(pe_table: jnp.ndarray, dtype) -> tuple[jnp.ndarray, int]:
    """One-time (hoisted) PE preprocessing: cast to the compute dtype and fold `group`
    consecutive rows into one lane-dense row of width group*d_model.  Do this ONCE at
    model build time, not per forward call."""
    max_len, d_model = pe_table.shape
    group = _LANES // math.gcd(d_model, _LANES)
    table = pe_table.astype(dtype)
    if group > 1:
        pad_rows = (-max_len) % group
        if pad_rows:
            table = jnp.pad(table, ((0, pad_rows), (0, 0)))
        table = table.reshape(-1, d_model * group)   # (ceil(max_len/group), group*d_model)
    return table, group


def _add_pe_kernel(x_ref, pe_ref, o_ref):
    # All refs are (TS, D_eff) VMEM tiles -> clean 2-D VPU add, no broadcast/relayout.
    o_ref[...] = x_ref[...] + pe_ref[...]


def _sublane_multiple(itemsize: int) -> int:
    # Native row-packing quantum: f32 -> 8, bf16/f16 -> 16, int8/fp8 -> 32.
    return _SUBLANES * max(1, 4 // itemsize)


def _pick_seq_tile(seq_len: int, d_eff: int, itemsize: int,
                   target_block_bytes: int, sub: int) -> int:
    """Rows per sequence tile: whole sequence if it fits the per-buffer budget,
    otherwise a dtype-aware sublane-aligned tile."""
    rows = max(1, target_block_bytes // (d_eff * itemsize))
    if rows >= seq_len:
        return seq_len
    return max(sub, (rows // sub) * sub)


def positional_encoding_forward(
    x: jnp.ndarray,
    packed_pe: jnp.ndarray,
    *,
    group: int,
    target_block_bytes: int = 6 * 1024 * 1024,   # ~6 MiB/buffer: amortizes step overhead,
                                                 # 6 live buffers still fit v7x's 64 MiB VMEM
    donate_x: bool = False,
) -> jnp.ndarray:
    """x: [B, S, D].  packed_pe/group come from pack_positional_encoding_table.
    Returns x + pe[:S] (eval-mode dropout == identity)."""
    B, S, D = x.shape
    rows_packed, d_eff = packed_pe.shape
    assert d_eff == D * group, "packed_pe does not match x's d_model / packing group"
    if packed_pe.dtype != x.dtype:
        # Callers should pre-pack in the model dtype to avoid this extra per-call pass.
        packed_pe = packed_pe.astype(x.dtype)

    itemsize = jnp.dtype(x.dtype).itemsize
    sub = _sublane_multiple(itemsize)

    # --- lane densification: fold `group` sequence rows into one lane-dense row ---------
    # If S is not a multiple of group, zero-pad the sequence (sliced off afterwards)
    # instead of falling back to lane-sparse (masked vst.msk) stores.
    s_pad = S if group == 1 else pl.cdiv(S, group) * group
    assert s_pad // group <= rows_packed, "seq_len exceeds the PE table's max_len"
    if s_pad != S:
        x = jnp.pad(x, ((0, 0), (0, s_pad - S), (0, 0)))
    s_eff = s_pad // group
    x_eff = x.reshape(B, s_eff, d_eff) if group > 1 else x

    ts = _pick_seq_tile(s_eff, d_eff, itemsize, target_block_bytes, sub)

    # v7x has 2 TensorCores: make sure the (parallel) grid has at least 2 steps so both
    # cores get work.  No-op on v5e/v6e (1 TC) and whenever B >= 2 or there are >= 2 tiles.
    if B * pl.cdiv(s_eff, ts) < 2 and s_eff >= 2 * sub:
        ts = max(sub, ((s_eff // 2) // sub) * sub)

    if ts % sub != 0:
        # Whole-sequence tile smaller than the packing quantum: the pe block must then
        # equal the pe operand's full dims -> trim to exactly s_eff rows (tiny-S only).
        pe_arg = packed_pe[:s_eff]
    else:
        # Aligned tiles: window directly into the full packed table via the BlockSpec.
        pe_arg = packed_pe

    grid = (pl.cdiv(s_eff, ts), B)   # batch innermost -> pe block index constant, no re-DMA

    block_bytes = ts * d_eff * itemsize
    # 6 live buffers (x / pe / out, double-buffered) plus headroom; capped under the
    # 64 MiB physical VMEM of v7x.  (A single-buffered pe via pl.Buffered(1) would free
    # one more tile of VMEM on v7x; kept at the default double-buffering here since the
    # budget already fits comfortably.)
    vmem_limit = int(min(56 * 1024 * 1024, max(32 * 1024 * 1024, 7 * block_bytes)))

    out = pl.pallas_call(
        _add_pe_kernel,
        out_shape=jax.ShapeDtypeStruct((B, s_eff, d_eff), x.dtype),
        grid_spec=pltpu.PrefetchScalarGridSpec(
            num_scalar_prefetch=0,
            grid=grid,
            in_specs=[
                # x: one (TS, D_eff) tile of one batch row per step (batch dim squeezed).
                pl.BlockSpec((pl.Squeezed(), ts, d_eff), lambda s, b: (b, s, 0)),
                # pe: same (TS, D_eff) tile for every inner (batch) step.
                pl.BlockSpec((ts, d_eff), lambda s, b: (s, 0)),
            ],
            out_specs=pl.BlockSpec((pl.Squeezed(), ts, d_eff), lambda s, b: (b, s, 0)),
        ),
        compiler_params=pltpu.CompilerParams(
            dimension_semantics=("parallel", "parallel"),
            vmem_limit_bytes=vmem_limit,
        ),
        input_output_aliases=({0: 0} if donate_x else {}),
    )(x_eff, pe_arg)

    out = out.reshape(B, s_pad, D)
    if s_pad != S:
        out = out[:, :S, :]
    return out


class PositionalEncoding:
    """JAX/Pallas counterpart of the PyTorch PositionalEncoding module (eval mode).

    The sinusoidal table is built, cast to `dtype` and lane-packed ONCE here (the
    analogue of register_buffer), so per-call work is only the streaming add kernel.
    """

    def __init__(self, d_model: int, max_len: int = 5000, dropout: float = 0.1,
                 dtype=jnp.float32):
        self.d_model = d_model
        self.max_len = max_len
        self.dropout_p = dropout  # TODO(synk): training-mode dropout not implemented (eval identity).
        pe = make_positional_encoding_table(d_model, max_len)
        self.packed_pe, self.group = pack_positional_encoding_table(pe, dtype)

    def __call__(self, x: jnp.ndarray, **kwargs) -> jnp.ndarray:
        assert x.shape[-1] == self.d_model and x.shape[-2] <= self.max_len
        return positional_encoding_forward(x, self.packed_pe, group=self.group, **kwargs)


if __name__ == "__main__":
    key = jax.random.PRNGKey(0)
    k0, k1, k2, k3 = jax.random.split(key, 4)

    # 1) Small shapes from the module's forward: [batch, seq_len, d_model]; D < 128 so the
    #    lane-densified (group=4) path is exercised.
    B, S, D, MAX_LEN = 2, 8, 32, 64
    mod = PositionalEncoding(D, max_len=MAX_LEN)
    pe_full = make_positional_encoding_table(D, MAX_LEN)
    x = jax.random.normal(k0, (B, S, D), dtype=jnp.float32)
    out = jax.block_until_ready(mod(x))
    ref = x + pe_full[None, :S, :]
    assert out.shape == (B, S, D)
    assert jnp.allclose(out, ref, atol=1e-6), "mismatch (lane-densified path)"

    # 2) d_model already a multiple of 128 lanes; tiny block budget forces a multi-tile
    #    sequence grid and the full-table-window path.
    B2, S2, D2 = 2, 128, 256
    mod2 = PositionalEncoding(D2, max_len=256)
    x2 = jax.random.normal(k1, (B2, S2, D2), dtype=jnp.float32)
    out2 = jax.block_until_ready(mod2(x2, target_block_bytes=64 * 1024))
    ref2 = x2 + make_positional_encoding_table(D2, 256)[None, :S2, :]
    assert out2.shape == (B2, S2, D2)
    assert jnp.allclose(out2, ref2, atol=1e-6), "mismatch (tiled path)"

    # 3) seq_len not a multiple of the densification group -> pad-and-slice path
    #    (no lane-sparse masked stores).
    B3, S3 = 2, 10
    x3 = jax.random.normal(k2, (B3, S3, D), dtype=jnp.float32)
    out3 = jax.block_until_ready(mod(x3))
    ref3 = x3 + pe_full[None, :S3, :]
    assert out3.shape == (B3, S3, D)
    assert jnp.allclose(out3, ref3, atol=1e-6), "mismatch (padded-sequence path)"

    # 4) bf16 path: table pre-cast once in __init__; dtype-aware sublane rounding.
    B4, S4, D4 = 2, 64, 128
    mod4 = PositionalEncoding(D4, max_len=128, dtype=jnp.bfloat16)
    x4 = jax.random.normal(k3, (B4, S4, D4), dtype=jnp.bfloat16)
    ref4 = x4 + make_positional_encoding_table(D4, 128)[None, :S4, :].astype(jnp.bfloat16)
    out4 = jax.block_until_ready(mod4(x4))
    assert out4.shape == (B4, S4, D4)
    assert jnp.allclose(out4.astype(jnp.float32), ref4.astype(jnp.float32),
                        atol=2e-2, rtol=2e-2), "mismatch (bf16 path)"

    print("KERNEL_OK")
</pallas_src>

<mosaic_0001>
module attributes {stable_mosaic.version = 11 : i64} {
  func.func @_add_pe_kernel(%arg0: i32, %arg1: i32, %arg2: memref<1x2x128xf32, #tpu.memory_space<vmem>>, %arg3: memref<2x128xf32, #tpu.memory_space<vmem>>, %arg4: memref<1x2x128xf32, #tpu.memory_space<vmem>>) attributes {dimension_semantics = [#tpu.dimension_semantics<parallel>, #tpu.dimension_semantics<parallel>], iteration_bounds = array<i64: 1, 2>, scalar_prefetch = 0 : i64, scratch_operands = 0 : i64, tpu.core_type = #tpu.core_type<tc>, window_params = [{transform_indices = @transform_0, window_bounds = array<i64: 1, 2, 128>}, {transform_indices = @transform_1, window_bounds = array<i64: 2, 128>}, {transform_indices = @transform_2, window_bounds = array<i64: 1, 2, 128>}]} {
    %c0 = arith.constant 0 : index
    %c0_0 = arith.constant 0 : index
    %c0_1 = arith.constant 0 : index
    %0 = vector.load %arg2[%c0, %c0_0, %c0_1] : memref<1x2x128xf32, #tpu.memory_space<vmem>>, vector<1x2x128xf32>
    %1 = vector.shape_cast %0 : vector<1x2x128xf32> to vector<2x128xf32>
    %c0_2 = arith.constant 0 : index
    %c0_3 = arith.constant 0 : index
    %2 = vector.load %arg3[%c0_2, %c0_3] : memref<2x128xf32, #tpu.memory_space<vmem>>, vector<2x128xf32>
    %3 = arith.addf %1, %2 : vector<2x128xf32>
    %c0_4 = arith.constant 0 : index
    %c0_5 = arith.constant 0 : index
    %c0_6 = arith.constant 0 : index
    %4 = vector.load %arg4[%c0_4, %c0_5, %c0_6] : memref<1x2x128xf32, #tpu.memory_space<vmem>>, vector<1x2x128xf32>
    %5 = vector.shape_cast %4 : vector<1x2x128xf32> to vector<2x128xf32>
    %6 = vector.shape_cast %3 : vector<2x128xf32> to vector<1x2x128xf32>
    tpu.vector_store %arg4[%c0_4, %c0_5, %c0_6], %6 {strides = array<i32>} : memref<1x2x128xf32, #tpu.memory_space<vmem>>, vector<1x2x128xf32>,
    return
  }
  func.func @transform_0(%arg0: i32, %arg1: i32) -> (i32, i32, i32) {
    %c0_i32 = arith.constant 0 : i32
    %c0_i32_0 = arith.constant 0 : i32
    return %arg1, %arg0, %c0_i32 : i32, i32, i32
  }
  func.func @transform_1(%arg0: i32, %arg1: i32) -> (i32, i32) {
    %c0_i32 = arith.constant 0 : i32
    %c0_i32_0 = arith.constant 0 : i32
    return %arg0, %c0_i32 : i32, i32
  }
  func.func @transform_2(%arg0: i32, %arg1: i32) -> (i32, i32, i32) {
    %c0_i32 = arith.constant 0 : i32
    %c0_i32_0 = arith.constant 0 : i32
    return %arg1, %arg0, %c0_i32 : i32, i32, i32
  }
}

</mosaic_0001>

<bundles_post_ra>
// kernel: tpu_custom_call.1
= control target key start
LH: loop header
LB: loop body
LE: loop exit
PB: predicated region body
PF: predicated region fallthrough
CT: control target
= control target key end

     0   :  { %7 = vsyncpa [#allocation3], 0  ;;  %s714_s0 = inlined_call_operand.hbm [shape: f32[2,2,128], index: 0, kind: input, shape index: {}]   ;;  %s715_s1 = inlined_call_operand.hbm [shape: f32[2,128], index: 1, kind: input, shape index: {}]   ;;  %s716_s2 = inlined_call_operand.hbm [shape: f32[2,2,128], index: 2, kind: output, shape index: {}]  }
   0x1   :  { %9 = vsyncpa [#allocation3 + $0x1], 0 }
   0x2   :  { %10 = vsyncpa [#allocation6], 0 }
   0x3   :  { %11 = vsyncpa [#allocation4], 0 }
   0x4   :  { %13 = vsyncpa [#allocation4 + $0x1], 0  ;;  %s565_s9 = smov 0   ;;  %s567_s10 = smov 0  }
   0x5   :  { %s569_s11 = smov 0   ;;  %s571_s12 = smov 0  }
   0x6   :  { %s573_s13 = smov 0   ;;  %s575_s14 = smov 0  }
   0x7 LB: > { %s313_s15 = sadd.s32 4294967295, %s547_s14   ;;  %s314_s16 = sadd.s32 4294967294, %s547_s14   ;;  %s547_s14 = sphi %s575_s14, %s19_s14   ;;  %s543_s13 = sphi %s573_s13, %s728_s13   ;;  %s539_s12 = sphi %s571_s12, %s727_s12   ;;  %s535_s11 = sphi %s569_s11, %s726_s11   ;;  %s531_s10 = sphi %s567_s10, %s725_s10   ;;  %s527_s9 = sphi %s565_s9, %s724_s9  }
   0x8   : > { %p53_p0 = scmp.ne.s32.totalorder %s531_s10, %s527_s9  ;;  %p599_p1 = scmp.eq.s32.totalorder %s313_s15, 0 }
   0x9   : > { %p603_p2 = scmp.eq.s32.totalorder %s313_s15, 1  ;;  %p111_p3 = scmp.eq.s32.totalorder %s314_s16, 1 }
   0xa   : > { %p609_p4 = por %p599_p1, %p53_p0  ;;  %p315_p5 = scmp.ge.s32.totalorder %s547_s14, 1 }
   0xb   : > { %p614_p6 = por %p111_p3, %p53_p0  ;;  %p118_p7 = scmp.lt.s32.totalorder %s547_s14, 3 }
   0xc   : > { %s132_s23 = sshll.u32 %s715_s1, 4  ;;  %p317_p9 = scmp.ge.s32.totalorder %s547_s14, 2  ;;  %s133_s23 = int_to_ptr.hbm [resolvable:$true] %s132_s23 }
   0xd   : > { %p622_p8 = pnand %p315_p5, %p118_p7  ;;  %s549_s25 = smov [#allocation5]  }
   0xe   : > { %s134_s26 = sshll.u32 %s549_s25, 4  ;;  %s28_s27 = sadd.s32 1, %s543_s13  ;;  %s135_s26 = int_to_ptr.vmem [resolvable:$true] %s134_s26 }
   0xf   : > { %p336_p10 = pneg %p622_p8  ;;  %p29_p12 = scmp.ge.s32.totalorder %s28_s27, 2 }
  0x10   : > { %s40_s28 = sadd.s32 1, %s535_s11  ;;  %p47_p13 = scmp.ne.s32.totalorder %s535_s11, %s531_s10 }
  0x11   : > { %p337_p11 = pnand %p336_p10, %p599_p1  ;;  %p48_p0 = scmp.eq.s32.totalorder %s547_s14, 0 }
  0x12   : > { %s730_s27 = smov (%p29_p12, %s28_s27), 0  ;;  %p644_p5 = por %p603_p2, %p47_p13 }
  0x13   : > { %339 = dma.hbm_to_vmem [thread:$0]  (!%p337_p11), %s133_s23, 32, %s135_s26, [#allocation6]  }
  0x14   : > { %p638_p3 = por %p48_p0, %p47_p13  ;;  %s35_s3 = ssub.s32 %s543_s13, %s730_s27 }
  0x15   : > { %p349_p7 = scmp.lt.s32.totalorder %s547_s14, 2  ;;  %p38_p10 = scmp.eq.s32.totalorder %s35_s3, 0 }
  0x16   : > { %s145_s4 = sand.u32 1, %s535_s11   ;;  %s319_s7 = sshll.u32 %s543_s13, 1 }
  0x17   : > { %s318_s5 = sshll.u32 %s145_s4, 1  ;;  %s154_s16 = scalar_lea.hbm %s714_s0, %s319_s7 }
  0x18   : > { %s653_s6 = scalar_select %p38_p10, %s535_s11, %s40_s28  }
  0x19   : > { %s149_s21 = scalar_lea.vmem [#allocation2], %s318_s5  ;;  %s156_s18 = sshll.u32 %s154_s16, 4  ;;  %s157_s18 = int_to_ptr.hbm [resolvable:$true] %s156_s18 }
  0x1a   : > { %s158_s22 = sshll.u32 %s149_s21, 4  ;;  %p341_p2 = pnand %p349_p7, %p638_p3  ;;  %s159_s22 = int_to_ptr.vmem [resolvable:$true] %s158_s22 }
  0x1b   : > { %s146_s23 = scalar_lea.sflag [#allocation3], %s145_s4  ;;  %167 = sbr.rel (%p622_p8) target bundleno = 50 (0x32), region = 28 }
  0x1c   : > { %343 = dma.hbm_to_vmem [thread:$0]  (!%p341_p2), %s157_s18, 32, %s159_s22, %s146_s23  }
  0x1d   : > { %s664_s25 = sand.u32 (!%p622_p8), 1, %s531_s10  }
  0x1e   : > { %s321_s26 = sshll.u32 (!%p622_p8), %s664_s25, 1  ;;  %s170_s28 = scalar_lea.sflag (!%p622_p8), [#allocation3], %s664_s25 }
  0x1f   : > { %s173_s3 = scalar_lea.vmem (!%p622_p8), [#allocation2], %s321_s26 }
  0x20   : > { %514 = dma.done.wait (%p609_p4), %s170_s28, 32  }
  0x21   : > { %516 = vsyncadd (%p609_p4), %s170_s28, 4294967264 }
  0x22   : > { %518 = dma.done.wait (%p599_p1), [#allocation6], 32  }
  0x23   : > { %520 = vsyncadd (%p599_p1), [#allocation6], 4294967264  ;;  %s325_s24 = sshll.u32 %s539_s12, 1  ;;  %s199_s7 = scalar_lea.vmem [#allocation7], %s321_s26  ;;  %v200_v0 = vld [vmem:[%s173_s3] sm:$0x3] }
  0x24   : > { %s216_s5 = scalar_lea.hbm %s716_s2, %s325_s24  ;;  %s218_s8 = sshll.u32 %s199_s7, 4  ;;  %v201_v1 = vld [vmem:[#allocation5] sm:$0x3]  ;;  %s219_s8 = int_to_ptr.vmem [resolvable:$true] %s218_s8 }
  0x25   : > { %s220_s15 = sshll.u32 %s216_s5, 4  ;;  %v202_v2 = vadd.f32 %v201_v1, %v200_v0  ;;  %s205_s19 = scalar_lea.sflag [#allocation4], %s664_s25  ;;  %s221_s15 = int_to_ptr.hbm [resolvable:$true] %s220_s15 }
  0x26   : > { %s475_s17 = sshra.s32 %s221_s15, 4  ;;  %s481_s22 = scalar_lea.hbm %s716_s2, 4  ;;  %s476_s17 = int_to_ptr.hbm [resolvable:$true] %s475_s17 }
  0x27   : > { %203 = vst [vmem:[%s199_s7] sm:$0x3] %v202_v2  ;;  %s477_s16 = scalar_lea.hbm %s476_s17, 2  ;;  %p482_p11 = scmp.lt.s32.totalorder %s476_s17, %s716_s2 }
  0x28   : > { %p478_p1 = scmp.ne.s32.totalorder %s476_s17, %s477_s16  ;;  %p483_p12 = scmp.lt.s32.totalorder %s481_s22, %s477_s16 }
  0x2a   : > { %p479_p4 = pnand %p478_p1, %p644_p5  ;;  %p484_p13 = por %p483_p12, %p482_p11 }
  0x2c   : > { %p480_p8 = pneg %p479_p4 }
  0x2e   : > { %p485_p0 = pnand %p484_p13, %p480_p8 }
  0x30   : > { %488 = shalt.err (!%p485_p0)
}
  0x31   : > { %334 = dma.vmem_to_hbm [thread:$0]  (%p644_p5), %s219_s8, 32, %s221_s15, %s205_s19  }
  0x32 PF: > { %s232_s25 = sand.u32 1, %s527_s9   ;;  %p345_p3 = pnand %p317_p9, %p614_p6 }
  0x33   : > { %s233_s26 = scalar_lea.sflag [#allocation4], %s232_s25 }
  0x34   : > { %p346_p7 = pneg %p345_p3 }
  0x36   : > { %522 = dma.done.wait (%p346_p7), %s233_s26, 32  }
  0x37   : > { %524 = vsyncadd (%p346_p7), %s233_s26, 4294967264  ;;  %s19_s14 = sadd.s32 1, %s547_s14   ;;  %s724_s9 = smov %s531_s10 }
  0x38   : > { %p16_p10 = scmp.ge.s32.totalorder %s19_s14, 4   ;;  %s725_s10 = smov %s535_s11 }
  0x39   : > { %s726_s11 = smov %s653_s6  ;;  %s727_s12 = smov %s543_s13 }
  0x3a   : > { %s728_s13 = smov %s730_s27  ;;  %18 = sbr.rel (!%p16_p10) target bundleno = 7 (0x7), region = 78 }
  0x3f   :  { %239 = vsyncpa [#allocation3], 1 }
  0x40   :  { %241 = vsyncpa [#allocation3 + $0x1], 1 }
  0x41   :  { %242 = vsyncpa [#allocation6], 1 }
  0x42   :  { %243 = vsyncpa [#allocation4], 1 }
  0x43   :  { %245 = vsyncpa [#allocation4 + $0x1], 1 }

</bundles_post_ra>
